<compile_context>
chip_gen: v7x
topology: tpu7x:2x2x1
jax: 0.10.0
libtpu: 0.0.40
codegen_flags: <defaults>
</compile_context>

<pallas_src>
import functools
import math

import jax
import jax.numpy as jnp
from jax.experimental import pallas as pl
from jax.experimental.pallas import tpu as pltpu


def _round_up(n, m):
    return ((n + m - 1) // m) * m


def actor_critic_kernel(x_ref, w1_ref, b1_ref, wh_ref, bh_ref, out_ref, *, action_dim):
    x = x_ref[...]                                                       # (TB, S)

    # fc1 + tanh  (MXU matmul; tanh on the EUP).
    h = jnp.tanh(
        jnp.dot(x, w1_ref[...], preferred_element_type=jnp.float32)
        + b1_ref[...]
    )                                                                    # (TB, H_pad)

    # Fused heads: one MXU pass produces action logits (lanes 0..A-1) and the
    # state value (lane A) in a single lane-dense tile.
    heads = (jnp.dot(h, wh_ref[...], preferred_element_type=jnp.float32)
             + bh_ref[...])                                              # (TB, OUT)

    col = jax.lax.broadcasted_iota(jnp.int32, heads.shape, 1)
    is_action = col < action_dim

    # Numerically-stable softmax over the action lanes only.
    logits = jnp.where(is_action, heads, -jnp.inf)
    m = jnp.max(logits, axis=-1, keepdims=True)
    e = jnp.where(is_action, jnp.exp(logits - m), 0.0)
    denom = jnp.sum(e, axis=-1, keepdims=True)

    # EUP approx reciprocal + one Newton step (~1e-7 rel) keeps the 1e-5 tolerance.
    r = pl.reciprocal(denom, approx=True)
    r = r * (2.0 - denom * r)
    probs = e * r

    # Lane-dense output slab: probs in lanes < A, value in lane A, zeros elsewhere.
    out_ref[...] = jnp.where(
        is_action, probs, jnp.where(col == action_dim, heads, 0.0)
    )


def prepare_actor_critic_params(params):
    """One-time parameter preparation: transpose, fuse heads, lane-pad.

    Done once (at init / load time) so the per-call forward does no HBM
    transposes or reshapes.
    """
    w1, b1, wa, ba, wv, bv = params
    w1 = jnp.asarray(w1, jnp.float32)   # (H, S)
    b1 = jnp.asarray(b1, jnp.float32)   # (H,)
    wa = jnp.asarray(wa, jnp.float32)   # (A, H)
    ba = jnp.asarray(ba, jnp.float32)   # (A,)
    wv = jnp.asarray(wv, jnp.float32)   # (1, H)
    bv = jnp.asarray(bv, jnp.float32)   # (1,)

    H, S = w1.shape
    A = wa.shape[0]
    H_pad = _round_up(H, 128)
    OUT = max(128, _round_up(A + 1, 128))

    # fc1, transposed to (S, H_pad), hidden lanes zero-padded (tanh(0)=0 downstream).
    w1t = jnp.zeros((S, H_pad), jnp.float32).at[:, :H].set(w1.T)
    b1r = jnp.zeros((1, H_pad), jnp.float32).at[0, :H].set(b1)

    # Fused head weight: action columns 0..A-1, value column A, rest zero.
    wh = (jnp.zeros((H_pad, OUT), jnp.float32)
          .at[:H, :A].set(wa.T)
          .at[:H, A].set(wv[0]))
    bh = (jnp.zeros((1, OUT), jnp.float32)
          .at[0, :A].set(ba)
          .at[0, A].set(bv[0]))

    return dict(w1t=w1t, b1r=b1r, wh=wh, bh=bh, action_dim=A)


def _pick_batch_tile(B):
    """Batch tile: multiple of 8 sublanes, capped at 1024 rows, and sized so the
    grid has >=2 steps whenever B > 8 (lets v7x's 2nd TensorCore participate)."""
    tb = _round_up(max(pl.cdiv(B, 2), 1), 8)
    return min(1024, max(8, tb))


def actor_critic_forward(x, prepped, *, return_packed=False):
    """Fused ActorCritic forward pass: one Pallas kernel per call.

    return_packed=True returns the lane-dense (B, 128) slab (probs in lanes < A,
    value in lane A) so consumers can skip the two post-kernel slice ops.
    """
    w1t, b1r, wh, bh = prepped["w1t"], prepped["b1r"], prepped["wh"], prepped["bh"]
    A = prepped["action_dim"]

    x = jnp.asarray(x, jnp.float32)
    B, S = x.shape
    H_pad = w1t.shape[1]
    OUT = wh.shape[1]

    TB = _pick_batch_tile(B)
    grid = (pl.cdiv(B, TB),)   # ragged last block: reads are junk rows, writeback is clipped

    slab = pl.pallas_call(
        functools.partial(actor_critic_kernel, action_dim=A),
        out_shape=jax.ShapeDtypeStruct((B, OUT), jnp.float32),
        grid=grid,
        in_specs=[
            pl.BlockSpec((TB, S), lambda i: (i, 0)),       # x: blocked along batch
            pl.BlockSpec((S, H_pad), lambda i: (0, 0)),    # fc1 weight (VMEM-resident)
            pl.BlockSpec((1, H_pad), lambda i: (0, 0)),    # fc1 bias
            pl.BlockSpec((H_pad, OUT), lambda i: (0, 0)),  # fused head weight
            pl.BlockSpec((1, OUT), lambda i: (0, 0)),      # fused head bias
        ],
        out_specs=pl.BlockSpec((TB, OUT), lambda i: (i, 0)),
        compiler_params=pltpu.CompilerParams(
            dimension_semantics=("parallel",),             # 2 TCs split batch on v7x
        ),
    )(x, w1t, b1r, wh, bh)

    if return_packed:
        return slab
    action_probs = slab[:, :A]
    state_values = slab[:, A:A + 1]
    return action_probs, state_values


def init_actor_critic_params(key, state_dim, action_dim, hidden_dim=64):
    """Deterministic init mirroring nn.Linear defaults: U(-1/sqrt(fan_in), 1/sqrt(fan_in))."""
    ks = jax.random.split(key, 6)

    def linear(kw, kb, fan_in, fan_out):
        bound = 1.0 / math.sqrt(fan_in)
        w = jax.random.uniform(kw, (fan_out, fan_in), jnp.float32, -bound, bound)
        b = jax.random.uniform(kb, (fan_out,), jnp.float32, -bound, bound)
        return w, b

    w1, b1 = linear(ks[0], ks[1], state_dim, hidden_dim)
    wa, ba = linear(ks[2], ks[3], hidden_dim, action_dim)
    wv, bv = linear(ks[4], ks[5], hidden_dim, 1)
    return (w1, b1, wa, ba, wv, bv)


def actor_critic_reference(x, params):
    """Plain-JAX reference for correctness checking."""
    w1, b1, wa, ba, wv, bv = params
    h = jnp.tanh(x @ w1.T + b1)
    probs = jax.nn.softmax(h @ wa.T + ba, axis=-1)
    values = h @ wv.T + bv
    return probs, values


if __name__ == "__main__":
    key = jax.random.PRNGKey(0)
    k_x, k_p = jax.random.split(key)

    batch, state_dim, action_dim, hidden_dim = 8, 16, 4, 64
    x = jax.random.normal(k_x, (batch, state_dim), jnp.float32)
    params = init_actor_critic_params(k_p, state_dim, action_dim, hidden_dim)

    # Hoisted, one-time parameter preparation (transpose / fuse / pad).
    prepped = prepare_actor_critic_params(params)

    probs, values = actor_critic_forward(x, prepped)
    jax.block_until_ready((probs, values))

    ref_probs, ref_values = actor_critic_reference(x, params)
    assert probs.shape == (batch, action_dim)
    assert values.shape == (batch, 1)
    assert jnp.allclose(probs, ref_probs, atol=1e-5, rtol=1e-5)
    assert jnp.allclose(values, ref_values, atol=1e-5, rtol=1e-5)
    assert jnp.allclose(jnp.sum(probs, axis=-1), 1.0, atol=1e-5)

    # Also exercise a ragged, multi-tile batch (no wrapper-side pad; last block clipped).
    batch2 = 37
    x2 = jax.random.normal(jax.random.PRNGKey(1), (batch2, state_dim), jnp.float32)
    probs2, values2 = actor_critic_forward(x2, prepped)
    jax.block_until_ready((probs2, values2))
    ref_probs2, ref_values2 = actor_critic_reference(x2, params)
    assert probs2.shape == (batch2, action_dim)
    assert values2.shape == (batch2, 1)
    assert jnp.allclose(probs2, ref_probs2, atol=1e-5, rtol=1e-5)
    assert jnp.allclose(values2, ref_values2, atol=1e-5, rtol=1e-5)

    print("KERNEL_OK")
</pallas_src>

<mosaic_0001>
module attributes {stable_mosaic.version = 11 : i64} {
  func.func @actor_critic_kernel(%arg0: i32, %arg1: memref<8x16xf32, #tpu.memory_space<vmem>>, %arg2: memref<16x128xf32, #tpu.memory_space<vmem>>, %arg3: memref<1x128xf32, #tpu.memory_space<vmem>>, %arg4: memref<128x128xf32, #tpu.memory_space<vmem>>, %arg5: memref<1x128xf32, #tpu.memory_space<vmem>>, %arg6: memref<8x128xf32, #tpu.memory_space<vmem>>) attributes {dimension_semantics = [#tpu.dimension_semantics<parallel>], iteration_bounds = array<i64: 1>, scalar_prefetch = 0 : i64, scratch_operands = 0 : i64, tpu.core_type = #tpu.core_type<tc>, window_params = [{transform_indices = @transform_0, window_bounds = array<i64: 8, 16>}, {pipeline_mode = #tpu.pipeline_mode<synchronous>, transform_indices = @transform_1, window_bounds = array<i64: 16, 128>}, {pipeline_mode = #tpu.pipeline_mode<synchronous>, transform_indices = @transform_2, window_bounds = array<i64: 1, 128>}, {pipeline_mode = #tpu.pipeline_mode<synchronous>, transform_indices = @transform_3, window_bounds = array<i64: 128, 128>}, {pipeline_mode = #tpu.pipeline_mode<synchronous>, transform_indices = @transform_4, window_bounds = array<i64: 1, 128>}, {transform_indices = @transform_5, window_bounds = array<i64: 8, 128>}]} {
    %c0 = arith.constant 0 : index
    %c0_0 = arith.constant 0 : index
    %0 = vector.load %arg1[%c0, %c0_0] : memref<8x16xf32, #tpu.memory_space<vmem>>, vector<8x16xf32>
    %c0_1 = arith.constant 0 : index
    %c0_2 = arith.constant 0 : index
    %1 = vector.load %arg2[%c0_1, %c0_2] : memref<16x128xf32, #tpu.memory_space<vmem>>, vector<16x128xf32>
    %cst = arith.constant dense<0.000000e+00> : vector<8x128xf32>
    %2 = tpu.matmul %0, %1, %cst {dimension_numbers = #tpu.dot_dimension_numbers<[1], [0], [0], [1], [0, 0, 1, 1], [], []>} : vector<8x16xf32>, vector<16x128xf32>, vector<8x128xf32> -> vector<8x128xf32>
    %c0_3 = arith.constant 0 : index
    %c0_4 = arith.constant 0 : index
    %3 = vector.load %arg3[%c0_3, %c0_4] : memref<1x128xf32, #tpu.memory_space<vmem>>, vector<1x128xf32>
    %4 = vector.broadcast %3 : vector<1x128xf32> to vector<8x128xf32>
    %5 = arith.addf %2, %4 : vector<8x128xf32>
    %6 = math.tanh %5 : vector<8x128xf32>
    %c0_5 = arith.constant 0 : index
    %c0_6 = arith.constant 0 : index
    %7 = vector.load %arg4[%c0_5, %c0_6] : memref<128x128xf32, #tpu.memory_space<vmem>>, vector<128x128xf32>
    %cst_7 = arith.constant dense<0.000000e+00> : vector<8x128xf32>
    %8 = tpu.matmul %6, %7, %cst_7 {dimension_numbers = #tpu.dot_dimension_numbers<[1], [0], [0], [1], [0, 0, 1, 1], [], []>} : vector<8x128xf32>, vector<128x128xf32>, vector<8x128xf32> -> vector<8x128xf32>
    %c0_8 = arith.constant 0 : index
    %c0_9 = arith.constant 0 : index
    %9 = vector.load %arg5[%c0_8, %c0_9] : memref<1x128xf32, #tpu.memory_space<vmem>>, vector<1x128xf32>
    %10 = vector.broadcast %9 : vector<1x128xf32> to vector<8x128xf32>
    %11 = arith.addf %8, %10 : vector<8x128xf32>
    %12 = tpu.iota {dimensions = array<i32: 1>} : vector<8x128xi32>
    %c4_i32 = arith.constant 4 : i32
    %13 = vector.broadcast %c4_i32 : i32 to vector<8x128xi32>
    %14 = arith.cmpi slt, %12, %13 : vector<8x128xi32>
    %cst_10 = arith.constant 0xFF800000 : f32
    %15 = vector.broadcast %cst_10 : f32 to vector<8x128xf32>
    %16 = arith.select %14, %11, %15 : vector<8x128xi1>, vector<8x128xf32>
    %cst_11 = arith.constant dense<0xFF800000> : vector<8xf32>
    %17 = vector.multi_reduction <maximumf>, %16, %cst_11 [1] : vector<8x128xf32> to vector<8xf32>
    %18 = vector.shape_cast %17 : vector<8xf32> to vector<8x1xf32>
    %19 = vector.broadcast %18 : vector<8x1xf32> to vector<8x128xf32>
    %20 = arith.subf %16, %19 : vector<8x128xf32>
    %21 = math.exp %20 : vector<8x128xf32>
    %cst_12 = arith.constant 0.000000e+00 : f32
    %22 = vector.broadcast %cst_12 : f32 to vector<8x128xf32>
    %23 = arith.select %14, %21, %22 : vector<8x128xi1>, vector<8x128xf32>
    %cst_13 = arith.constant dense<0.000000e+00> : vector<8xf32>
    %24 = vector.multi_reduction <add>, %23, %cst_13 [1] : vector<8x128xf32> to vector<8xf32>
    %25 = vector.shape_cast %24 : vector<8xf32> to vector<8x1xf32>
    %26 = tpu.reciprocal %25 {approx = true} : vector<8x1xf32> -> vector<8x1xf32>
    %27 = arith.mulf %25, %26 : vector<8x1xf32>
    %cst_14 = arith.constant 2.000000e+00 : f32
    %28 = vector.broadcast %cst_14 : f32 to vector<8x1xf32>
    %29 = arith.subf %28, %27 : vector<8x1xf32>
    %30 = arith.mulf %26, %29 : vector<8x1xf32>
    %31 = vector.broadcast %30 : vector<8x1xf32> to vector<8x128xf32>
    %32 = arith.mulf %23, %31 : vector<8x128xf32>
    %c4_i32_15 = arith.constant 4 : i32
    %33 = vector.broadcast %c4_i32_15 : i32 to vector<8x128xi32>
    %34 = arith.cmpi eq, %12, %33 : vector<8x128xi32>
    %cst_16 = arith.constant 0.000000e+00 : f32
    %35 = vector.broadcast %cst_16 : f32 to vector<8x128xf32>
    %36 = arith.select %34, %11, %35 : vector<8x128xi1>, vector<8x128xf32>
    %37 = arith.select %14, %32, %36 : vector<8x128xi1>, vector<8x128xf32>
    %c0_17 = arith.constant 0 : index
    %c0_18 = arith.constant 0 : index
    %38 = vector.load %arg6[%c0_17, %c0_18] : memref<8x128xf32, #tpu.memory_space<vmem>>, vector<8x128xf32>
    tpu.vector_store %arg6[%c0_17, %c0_18], %37 {strides = array<i32>} : memref<8x128xf32, #tpu.memory_space<vmem>>, vector<8x128xf32>,
    return
  }
  func.func @transform_0(%arg0: i32) -> (i32, i32) {
    %c0_i32 = arith.constant 0 : i32
    %c0_i32_0 = arith.constant 0 : i32
    return %arg0, %c0_i32 : i32, i32
  }
  func.func @transform_1(%arg0: i32) -> (i32, i32) {
    %c0_i32 = arith.constant 0 : i32
    %c0_i32_0 = arith.constant 0 : i32
    %c0_i32_1 = arith.constant 0 : i32
    return %c0_i32, %c0_i32_0 : i32, i32
  }
  func.func @transform_2(%arg0: i32) -> (i32, i32) {
    %c0_i32 = arith.constant 0 : i32
    %c0_i32_0 = arith.constant 0 : i32
    %c0_i32_1 = arith.constant 0 : i32
    return %c0_i32, %c0_i32_0 : i32, i32
  }
  func.func @transform_3(%arg0: i32) -> (i32, i32) {
    %c0_i32 = arith.constant 0 : i32
    %c0_i32_0 = arith.constant 0 : i32
    %c0_i32_1 = arith.constant 0 : i32
    return %c0_i32, %c0_i32_0 : i32, i32
  }
  func.func @transform_4(%arg0: i32) -> (i32, i32) {
    %c0_i32 = arith.constant 0 : i32
    %c0_i32_0 = arith.constant 0 : i32
    %c0_i32_1 = arith.constant 0 : i32
    return %c0_i32, %c0_i32_0 : i32, i32
  }
  func.func @transform_5(%arg0: i32) -> (i32, i32) {
    %c0_i32 = arith.constant 0 : i32
    %c0_i32_0 = arith.constant 0 : i32
    return %arg0, %c0_i32 : i32, i32
  }
}

</mosaic_0001>

<bundles_post_ra>
// kernel: tpu_custom_call.1
= control target key start
LH: loop header
LB: loop body
LE: loop exit
PB: predicated region body
PF: predicated region fallthrough
CT: control target
= control target key end

     0   :  { %10 = vsyncpa [#allocation3], 0  ;;  %s578_s0 = inlined_call_operand.hbm [shape: f32[8,16], index: 0, kind: input, shape index: {}]   ;;  %s579_s1 = inlined_call_operand.hbm [shape: f32[16,128], index: 1, kind: input, shape index: {}]   ;;  %s580_s2 = inlined_call_operand.vmem [shape: f32[1,128], index: 2, kind: input, shape index: {}]   ;;  %s581_s3 = inlined_call_operand.hbm [shape: f32[128,128], index: 3, kind: input, shape index: {}]   ;;  %s582_s4 = inlined_call_operand.vmem [shape: f32[1,128], index: 4, kind: input, shape index: {}]   ;;  %s583_s5 = inlined_call_operand.hbm [shape: f32[8,128], index: 5, kind: output, shape index: {}]  }
   0x1   :  { %11 = vsyncpa [#allocation6], 0 }
   0x2   :  { %12 = vsyncpa [#allocation4], 0  ;;  %s476_s18 = smov [#allocation5]   ;;  %s382_s22 = scalar_lea.hbm %s579_s1, 256 }
   0x3   :  { %s28_s19 = sshll.u32 %s476_s18, 4  ;;  %p383_p0 = scmp.ne.s32.totalorder %s579_s1, %s382_s22  ;;  %s29_s19 = int_to_ptr.vmem [resolvable:$true] %s28_s19 }
   0x4   :  { %p386_p1 = scmp.lt.u32.totalorder %s382_s22, %s579_s1 }
   0x6   :  { %p388_p2 = pnand %p386_p1, %p383_p0 }
   0x8   :  { %391 = shalt.err (!%p388_p2)
}
   0x9   :  { %s392_s27 = scalar_lea.vmem %s29_s19, 256  ;;  %p397_p4 = scmp.lt.s32.totalorder %s29_s19, %s29_s19 }
   0xa   :  { %p393_p3 = scmp.ne.s32.totalorder %s29_s19, %s392_s27  ;;  %p398_p5 = scmp.lt.s32.totalorder %s392_s27, %s392_s27 }
   0xc   :  { %p399_p6 = por %p398_p5, %p397_p4 }
   0xe   :  { %p400_p7 = pnand %p399_p6, %p393_p3 }
  0x10   :  { %403 = shalt.err (!%p400_p7)
}
  0x11   :  { %s477_s28 = smov 128   ;;  %s478_s29 = smov 8  }
  0x12   :  { %34 = dma.hbm_to_vmem [thread:$0]  %s579_s1, 256, %s29_s19, [#allocation6], %s477_s28, %s477_s28, %s478_s29  }
  0x13   :  { %s479_s7 = smov [#allocation2]   ;;  %s480_s9 = smov [#allocation7]  }
  0x14   :  { %s19_s8 = sshll.u32 %s479_s7, 4  ;;  %s42_s10 = sshll.u32 %s480_s9, 4  ;;  %s20_s8 = int_to_ptr.vmem [resolvable:$true] %s19_s8  ;;  %s43_s10 = int_to_ptr.vmem [resolvable:$true] %s42_s10 }
  0x15   :  { %s404_s13 = scalar_lea.hbm %s578_s0, 128 }
  0x16   :  { %p405_p8 = scmp.ne.s32.totalorder %s578_s0, %s404_s13  ;;  %p408_p9 = scmp.lt.u32.totalorder %s404_s13, %s578_s0 }
  0x18   :  { %p410_p10 = pnand %p408_p9, %p405_p8 }
  0x1a   :  { %413 = shalt.err (!%p410_p10)
}
  0x1b   :  { %s414_s1 = scalar_lea.vmem %s20_s8, 128  ;;  %p419_p12 = scmp.lt.s32.totalorder %s20_s8, %s20_s8 }
  0x1c   :  { %p415_p11 = scmp.ne.s32.totalorder %s20_s8, %s414_s1  ;;  %p420_p13 = scmp.lt.s32.totalorder %s414_s1, %s414_s1 }
  0x1e   :  { %p421_p0 = por %p420_p13, %p419_p12 }
  0x20   :  { %p422_p1 = pnand %p421_p0, %p415_p11 }
  0x22   :  { %425 = shalt.err (!%p422_p1)
}
  0x23   :  { %22 = dma.hbm_to_vmem [thread:$0]  %s578_s0, 128, %s20_s8, [#allocation3]  }
  0x24   :  { %s426_s22 = scalar_lea.hbm %s581_s3, 2048 }
  0x25   :  { %p427_p2 = scmp.ne.s32.totalorder %s581_s3, %s426_s22  ;;  %p430_p3 = scmp.lt.u32.totalorder %s426_s22, %s581_s3 }
  0x27   :  { %p432_p4 = pnand %p430_p3, %p427_p2 }
  0x29   :  { %435 = shalt.err (!%p432_p4)
}
  0x2a   :  { %s436_s27 = scalar_lea.vmem %s43_s10, 2048  ;;  %p441_p6 = scmp.lt.s32.totalorder %s43_s10, %s43_s10 }
  0x2b   :  { %p437_p5 = scmp.ne.s32.totalorder %s43_s10, %s436_s27  ;;  %p442_p7 = scmp.lt.s32.totalorder %s436_s27, %s436_s27 }
  0x2d   :  { %p443_p8 = por %p442_p7, %p441_p6 }
  0x2f   :  { %p444_p9 = pnand %p443_p8, %p437_p5 }
  0x31   :  { %447 = shalt.err (!%p444_p9)
}
  0x32   :  { %48 = dma.hbm_to_vmem [thread:$0]  %s581_s3, 2048, %s43_s10, [#allocation6], %s477_s28, %s477_s28, %s478_s29  }
  0x33   :  { %470 = dma.done.wait [#allocation3], 128  }
  0x34   :  { %471 = vsyncadd [#allocation3], 4294967168 }
  0x35   :  { %472 = dma.done.wait [#allocation6], 2304  }
  0x36   :  { %473 = vsyncadd [#allocation6], 4294964992  ;;  %v481_v0 = vmov 0.0|0.0   ;;  %vm482_vm0 = vmmov 0   ;;  %v483_v1 = vmov 0.0   ;;  %v61_v2 = vld [vmem:[#allocation5] sm:$0xff]  ;;  %v238_v35 = vlaneseq }
  0x37   :  { %340 = vmatprep.subr.bf16.mxu0 %v481_v0  ;;  %302 = vmatprep.mubr.msk.f32.mxu0 %vm482_vm0, %v483_v1  ;;  %v62_v3 = vld [vmem:[#allocation5 + $0x8] sm:$0xff]  ;;  %v145_v5 = vld [vmem:[#allocation7] sm:$0xff]  ;;  %v146_v6 = vld [vmem:[#allocation7 + $0x8] sm:$0xff]  ;;  %vm70_vm1 = vcmask 130048  }
  0x38   :  { %343 = vmatprep.subr.bf16.mxu1 %v481_v0  ;;  %337 = vmatprep.mubr.msk.f32.mxu1 %vm482_vm0, %v483_v1  ;;  %v341_v4 = vpack.c.bf16 %v62_v3, %v61_v2  ;;  %v147_v7 = vld [vmem:[#allocation7 + $0x10] sm:$0xff]  ;;  %v344_v8 = vpack.c.bf16 %v146_v6, %v145_v5  ;;  %v148_v9 = vld [vmem:[#allocation7 + $0x18] sm:$0xff]  ;;  %v60_v10 = vld [vmem:[#allocation2] sm:$0xff]  ;;  %v239_v36 = vand.u32 127, %v238_v35 }
  0x39   :  { %v347_v11 = vpack.c.bf16 %v148_v9, %v147_v7  ;;  %v149_v12 = vld [vmem:[#allocation7 + $0x20] sm:$0xff]  ;;  %v150_v13 = vld [vmem:[#allocation7 + $0x28] sm:$0xff]  ;;  %v151_v15 = vld [vmem:[#allocation7 + $0x30] sm:$0xff] }
  0x3a   :  { %342 = vmatpush3.bf16.msra.mxu0 %v341_v4  ;;  %345 = vmatpush3.bf16.msra.mxu1 %v344_v8  ;;  %v350_v14 = vpack.c.bf16 %v150_v13, %v149_v12  ;;  %v152_v16 = vld [vmem:[#allocation7 + $0x38] sm:$0xff]  ;;  %v153_v18 = vld [vmem:[#allocation7 + $0x40] sm:$0xff]  ;;  %v154_v19 = vld [vmem:[#allocation7 + $0x48] sm:$0xff]  ;;  %vm255_vm2 = vcmp.eq.s32.totalorder %v239_v36, 4  ;;  %vm240_vm3 = vcmp.lt.s32.totalorder %v239_v36, 4 }
  0x3b   :  { %346 = vmatprep.subr.bf16.mxu1 %v481_v0  ;;  %v353_v17 = vpack.c.bf16 %v152_v16, %v151_v15  ;;  %v356_v20 = vpack.c.bf16 %v154_v19, %v153_v18  ;;  %v155_v21 = vld [vmem:[#allocation7 + $0x50] sm:$0xff]  ;;  %v156_v22 = vld [vmem:[#allocation7 + $0x58] sm:$0xff]  ;;  %v157_v24 = vld [vmem:[#allocation7 + $0x60] sm:$0xff] }
  0x3c   :  { %v359_v23 = vpack.c.bf16 %v156_v22, %v155_v21  ;;  %v158_v25 = vld [vmem:[#allocation7 + $0x68] sm:$0xff]  ;;  %v159_v27 = vld [vmem:[#allocation7 + $0x70] sm:$0xff]  ;;  %v160_v28 = vld [vmem:[#allocation7 + $0x78] sm:$0xff] }
  0x3d   :  { %303 = vmatmul.mubr.msk.f32.vlgmr.msra.gmra.mrb[0].mxu0 %vm70_vm1, %v60_v10  ;;  %v362_v26 = vpack.c.bf16 %v158_v25, %v157_v24  ;;  %v365_v29 = vpack.c.bf16 %v160_v28, %v159_v27  ;;  %v275_v30 = vld [vmem:[%s580_s2] ss:$0 sm:$0xff]  ;;  %s484_s2 = smov [#allocation8]  }
  0x3e   :  { %348 = vmatpush3.bf16.msra.mxu1 %v347_v11  ;;  %v277_v37 = vld [vmem:[%s582_s4] ss:$0 sm:$0xff]  ;;  %s265_s4 = sshll.u32 %s484_s2, 4  ;;  %s266_s4 = int_to_ptr.vmem [resolvable:$true] %s265_s4 }
  0x3f   :  { %349 = vmatprep.subr.bf16.mxu1 %v481_v0  ;;  %s448_s7 = scalar_lea.vmem %s266_s4, 128  ;;  %p453_p11 = scmp.lt.s32.totalorder %s266_s4, %s266_s4 }
  0x40   :  { %p449_p10 = scmp.ne.s32.totalorder %s266_s4, %s448_s7  ;;  %p454_p12 = scmp.lt.s32.totalorder %s448_s7, %s448_s7 }
  0x42   :  { %351 = vmatpush3.bf16.msra.mxu1 %v350_v14  ;;  %p455_p13 = por %p454_p12, %p453_p11 }
  0x43   :  { %352 = vmatprep.subr.bf16.mxu1 %v481_v0 }
  0x44   :  { %p456_p0 = pnand %p455_p13, %p449_p10 }
  0x46   :  { %354 = vmatpush3.bf16.msra.mxu1 %v353_v17 }
  0x47   :  { %355 = vmatprep.subr.bf16.mxu1 %v481_v0 }
  0x4a   :  { %357 = vmatpush3.bf16.msra.mxu1 %v356_v20 }
  0x4b   :  { %358 = vmatprep.subr.bf16.mxu1 %v481_v0 }
  0x4e   :  { %360 = vmatpush3.bf16.msra.mxu1 %v359_v23 }
  0x4f   :  { %361 = vmatprep.subr.bf16.mxu1 %v481_v0 }
  0x52   :  { %363 = vmatpush3.bf16.msra.mxu1 %v362_v26 }
  0x53   :  { %364 = vmatprep.subr.bf16.mxu1 %v481_v0 }
  0x56   :  { %366 = vmatpush3.bf16.msra.mxu1 %v365_v29 }
 0x110   :  { %v140_v31 = vpop.f32.mrb[0].mxu0 }
 0x111   :  { %v141_v32 = vadd.f32 %v275_v30, %v140_v31  ;;  %v304_v33 = vpop.f32.mrb[1].mxu0 }
 0x113   :  { %376 = vtanh.f32 %v141_v32 }
 0x11d   :  { %v377_v34 = vpop.eup %376 }
 0x11e   :  { %338 = vmatmul.mubr.f32.vlgmr.msra.gmra.mrb[0].mxu1 %v377_v34 }
 0x1f1   :  { %v234_v38 = vpop.f32.mrb[0].mxu1 }
 0x1f2   :  { %v235_v39 = vadd.f32 %v277_v37, %v234_v38  ;;  %v339_v40 = vpop.f32.mrb[1].mxu1 }
 0x1f4   :  { %v256_v41 = vsel %vm255_vm2, %v235_v39, 0.0  ;;  %v241_v42 = vsel %vm240_vm3, %v235_v39, -inf }
 0x1f5   :  { %242 = vmax.xlane.f32.xlu0 %v241_v42 }
 0x282   :  { %v243_v43 = vpop.xlane.xlu0 %242 }
 0x283   :  { %v244_v44 = vsub.f32 %v241_v42, %v243_v43 }
 0x285   :  { %v245_v45 = vmul.f32 1.442695, %v244_v44 }
 0x287   :  { %378 = vpow2.f32 %v245_v45 }
 0x291   :  { %v379_v46 = vpop.eup %378 }
 0x292   :  { %v247_v47 = vsel %vm240_vm3, %v379_v46, 0.0 }
 0x293   :  { %248 = vadd.xlane.f32.xlu0 %v247_v47 }
 0x320   :  { %v249_v48 = vpop.xlane.xlu0 %248 }
 0x321   :  { %380 = vrcp.f32 %v249_v48 }
 0x32b   :  { %v381_v49 = vpop.eup %380 }
 0x32c   :  { %v251_v50 = vmul.f32 %v381_v49, %v249_v48 }
 0x32e   :  { %v252_v51 = vsub.f32 2.0, %v251_v50 }
 0x330   :  { %v253_v52 = vmul.f32 %v381_v49, %v252_v51 }
 0x332   :  { %v254_v53 = vmul.f32 %v253_v52, %v247_v47 }
 0x334   :  { %v257_v54 = vsel %vm240_vm3, %v254_v53, %v256_v41 }
 0x335   :  { %258 = vst [vmem:[#allocation8] sm:$0xff] %v257_v54 }
 0x336   :  { %459 = shalt.err (!%p456_p0)
}
 0x337   :  { %s460_s10 = scalar_lea.hbm %s583_s5, 128 }
 0x338   :  { %p461_p1 = scmp.ne.s32.totalorder %s583_s5, %s460_s10  ;;  %p464_p2 = scmp.lt.u32.totalorder %s460_s10, %s583_s5 }
 0x33a   :  { %p466_p3 = pnand %p464_p2, %p461_p1 }
 0x33c   :  { %469 = shalt.err (!%p466_p3)
}
 0x33d   :  { %268 = dma.vmem_to_hbm [thread:$0]  %s266_s4, 128, %s583_s5, [#allocation4]  }
 0x33e   :  { %474 = dma.done.wait [#allocation4], 128  }
 0x33f   :  { %475 = vsyncadd [#allocation4], 4294967168 }
 0x340   :  { %272 = vsyncpa [#allocation3], 1 }
 0x341   :  { %273 = vsyncpa [#allocation6], 1 }
 0x342   :  { %274 = vsyncpa [#allocation4], 1 }

</bundles_post_ra>
